<compile_context>
chip_gen: v7x
topology: tpu7x:2x2x1
jax: 0.10.0
libtpu: 0.0.40
codegen_flags: <defaults>
</compile_context>

<pallas_src>
import functools

import jax
import jax.numpy as jnp
from jax.experimental import pallas as pl
from jax.experimental.pallas import tpu as pltpu

BN_EPS = 1e-5


def _round_up(a, b):
    return (a + b - 1) // b * b


def _pick_tile_h(h_out, w_out, cout_p):
    """Largest divisor of h_out keeping the f32 output tile ~<=1 MiB,
    and at least two h-tiles when h_out >= 8 (megacore load balance)."""
    target = max(1, (1 << 20) // (w_out * cout_p * 4))
    if h_out >= 8:
        target = min(target, h_out // 2)
    best = 1
    for d in range(1, h_out + 1):
        if h_out % d == 0 and d <= target:
            best = d
    return best


def _conv_bn_swish_kernel(x_ref, w_ref, b_ref, o_ref, *,
                          k, stride, dilation, tile_h, w_out, win_h):
    # x_ref: (1, Hp, Wp, Cin_p)  bf16   padded NHWC image (one batch sample, resident per n)
    # w_ref: (k*k*Cin_p, Cout_p) bf16   BN-folded, zero-padded conv weight
    # b_ref: (1, Cout_p)         f32    BN-folded bias
    # o_ref: (1, tile_h, w_out, Cout_p) f32
    cin_p = x_ref.shape[-1]
    cout_p = o_ref.shape[-1]

    t = pl.program_id(1)
    step = tile_h * stride
    h_start = t * step
    if step & (step - 1) == 0:  # power-of-two: give Mosaic an alignment hint
        h_start = pl.multiple_of(h_start, step)

    # Row window covering this output tile plus its (k-1)*dilation halo.
    win = x_ref[0, pl.ds(h_start, win_h), :, :]          # (win_h, Wp, Cin_p)

    # im2col: k*k shifted/strided views, lane-aligned concat (Cin_p % 128 == 0).
    taps = []
    for kh in range(k):
        for kw in range(k):
            h0 = kh * dilation
            w0 = kw * dilation
            taps.append(jax.lax.slice(
                win,
                (h0, w0, 0),
                (h0 + (tile_h - 1) * stride + 1,
                 w0 + (w_out - 1) * stride + 1,
                 cin_p),
                (stride, stride, 1)))                    # (tile_h, w_out, Cin_p)
    patches = jnp.concatenate(taps, axis=-1)             # (tile_h, w_out, k*k*Cin_p)
    patches = patches.reshape(tile_h * w_out, k * k * cin_p)

    # Single MXU matmul with f32 accumulation, then folded-BN bias + Swish.
    acc = jnp.dot(patches, w_ref[...], preferred_element_type=jnp.float32)
    y = acc + b_ref[...]                                 # (HW, Cout_p) + (1, Cout_p)
    out = y * jax.nn.sigmoid(y)
    o_ref[0] = out.reshape(tile_h, w_out, cout_p).astype(o_ref.dtype)


def conv_bn_swish(x_nchw, weight_oihw, gamma, beta, running_mean, running_var,
                  *, stride=1, dilation=1, eps=BN_EPS):
    """ConvBNSwish forward.  Input NCHW, weight OIHW (PyTorch conventions)."""
    N, Cin, H, W = x_nchw.shape
    Cout, Cin_w, k, k2 = weight_oihw.shape
    assert k == k2 and Cin_w == Cin  # groups=1 only
    pad = dilation * (k - 1) // 2
    h_out = (H + 2 * pad - dilation * (k - 1) - 1) // stride + 1
    w_out = (W + 2 * pad - dilation * (k - 1) - 1) // stride + 1
    Hp, Wp = H + 2 * pad, W + 2 * pad

    cin_p = _round_up(Cin, 128)    # lane-dense input channels (aligned im2col concat)
    cout_p = _round_up(Cout, 128)  # lane-dense output channels (unmasked stores)

    # ---- host-side glue: BN folding, channel padding, layout, bf16 cast ----
    f32 = jnp.float32
    scale = gamma.astype(f32) * jax.lax.rsqrt(running_var.astype(f32) + eps)
    w_hwio = jnp.transpose(weight_oihw.astype(f32), (2, 3, 1, 0))        # (k,k,Cin,Cout)
    w_fold = w_hwio * scale[None, None, None, :]
    w_pad = jnp.zeros((k, k, cin_p, cout_p), f32).at[:, :, :Cin, :Cout].set(w_fold)
    w_flat = w_pad.reshape(k * k * cin_p, cout_p).astype(jnp.bfloat16)

    bias = beta.astype(f32) - running_mean.astype(f32) * scale
    bias_p = jnp.zeros((1, cout_p), f32).at[0, :Cout].set(bias)

    x_nhwc = jnp.transpose(x_nchw, (0, 2, 3, 1)).astype(jnp.bfloat16)
    # TODO(synk): fold the spatial zero-pad into the kernel (masked edge taps) to avoid
    # this extra HBM pass on very large activations.
    x_p = jnp.pad(x_nhwc, ((0, 0), (pad, pad), (pad, pad), (0, cin_p - Cin)))

    tile_h = _pick_tile_h(h_out, w_out, cout_p)
    n_h_tiles = h_out // tile_h
    win_h = (tile_h - 1) * stride + (k - 1) * dilation + 1

    kernel = functools.partial(
        _conv_bn_swish_kernel, k=k, stride=stride, dilation=dilation,
        tile_h=tile_h, w_out=w_out, win_h=win_h)

    cost = pl.CostEstimate(
        flops=2 * N * h_out * w_out * k * k * Cin * Cout + 4 * N * h_out * w_out * Cout,
        transcendentals=N * h_out * w_out * Cout,
        bytes_accessed=(x_p.size * 2 + w_flat.size * 2 + bias_p.size * 4
                        + N * h_out * w_out * cout_p * 4),
    )

    out_p = pl.pallas_call(
        kernel,
        out_shape=jax.ShapeDtypeStruct((N, h_out, w_out, cout_p), jnp.float32),
        grid=(N, n_h_tiles),
        in_specs=[
            pl.BlockSpec((1, Hp, Wp, cin_p), lambda n, t: (n, 0, 0, 0)),
            pl.BlockSpec((k * k * cin_p, cout_p), lambda n, t: (0, 0)),
            pl.BlockSpec((1, cout_p), lambda n, t: (0, 0)),
        ],
        out_specs=pl.BlockSpec((1, tile_h, w_out, cout_p),
                               lambda n, t: (n, t, 0, 0)),
        compiler_params=pltpu.CompilerParams(
            dimension_semantics=("parallel", "parallel")),
        cost_estimate=cost,
    )(x_p, w_flat, bias_p)

    out_nhwc = out_p[..., :Cout]                       # drop channel padding
    return jnp.transpose(out_nhwc, (0, 3, 1, 2))       # back to NCHW


def _reference_f32(x, w, gamma, beta, mean, var, *, stride=1, dilation=1, eps=BN_EPS):
    """Exact module semantics (eval mode) in f32."""
    k = w.shape[-1]
    pad = dilation * (k - 1) // 2
    conv = jax.lax.conv_general_dilated(
        x.astype(jnp.float32), w.astype(jnp.float32),
        window_strides=(stride, stride), padding=((pad, pad), (pad, pad)),
        rhs_dilation=(dilation, dilation),
        dimension_numbers=("NCHW", "OIHW", "NCHW"))
    y = (conv - mean[None, :, None, None]) / jnp.sqrt(var[None, :, None, None] + eps) \
        * gamma[None, :, None, None] + beta[None, :, None, None]
    return y * jax.nn.sigmoid(y)


def _reference_bf16(x, w, gamma, beta, mean, var, *, stride=1, dilation=1, eps=BN_EPS):
    """Same math with the bf16 quantization of x / folded weight the kernel uses."""
    k = w.shape[-1]
    pad = dilation * (k - 1) // 2
    scale = gamma / jnp.sqrt(var + eps)
    w_fold = (w.astype(jnp.float32) * scale[:, None, None, None]).astype(jnp.bfloat16)
    conv = jax.lax.conv_general_dilated(
        x.astype(jnp.bfloat16), w_fold,
        window_strides=(stride, stride), padding=((pad, pad), (pad, pad)),
        rhs_dilation=(dilation, dilation),
        dimension_numbers=("NCHW", "OIHW", "NCHW"),
        preferred_element_type=jnp.float32)
    y = conv + (beta - mean * scale)[None, :, None, None]
    return y * jax.nn.sigmoid(y)


if __name__ == "__main__":
    # Small shapes consistent with the module: batch=2, Cin=4, Cout=8, H=W=16, k=3.
    N, Cin, Cout, H, W, k = 2, 4, 8, 16, 16, 3

    key = jax.random.PRNGKey(0)
    kx, kw, kg, kb, km, kv = jax.random.split(key, 6)
    x = jax.random.normal(kx, (N, Cin, H, W), dtype=jnp.float32)
    weight = jax.random.normal(kw, (Cout, Cin, k, k), dtype=jnp.float32) * 0.1
    gamma = jax.random.uniform(kg, (Cout,), dtype=jnp.float32, minval=0.5, maxval=1.5)
    beta = jax.random.normal(kb, (Cout,), dtype=jnp.float32) * 0.1
    running_mean = jax.random.normal(km, (Cout,), dtype=jnp.float32) * 0.1
    running_var = jax.random.uniform(kv, (Cout,), dtype=jnp.float32,
                                     minval=0.5, maxval=1.5)

    out = conv_bn_swish(x, weight, gamma, beta, running_mean, running_var)
    out = jax.block_until_ready(out)
    assert out.shape == (N, Cout, H, W), out.shape

    # Tight check against a bf16-consistent reference (same quantization as the kernel).
    ref_bf16 = jax.block_until_ready(
        _reference_bf16(x, weight, gamma, beta, running_mean, running_var))
    assert jnp.allclose(out, ref_bf16, atol=1e-3, rtol=1e-3), float(
        jnp.max(jnp.abs(out - ref_bf16)))

    # Looser sanity check against the exact f32 module semantics (bf16 cast error bound).
    ref_f32 = jax.block_until_ready(
        _reference_f32(x, weight, gamma, beta, running_mean, running_var))
    assert jnp.allclose(out, ref_f32, atol=5e-2, rtol=5e-2), float(
        jnp.max(jnp.abs(out - ref_f32)))

    print("KERNEL_OK")
</pallas_src>

<mosaic_0001>
module attributes {stable_mosaic.version = 11 : i64} {
  func.func @_conv_bn_swish_kernel(%arg0: i32, %arg1: i32, %arg2: memref<1x18x18x128xbf16, #tpu.memory_space<vmem>>, %arg3: memref<1152x128xbf16, #tpu.memory_space<vmem>>, %arg4: memref<1x128xf32, #tpu.memory_space<vmem>>, %arg5: memref<1x8x16x128xf32, #tpu.memory_space<vmem>>) attributes {dimension_semantics = [#tpu.dimension_semantics<parallel>, #tpu.dimension_semantics<parallel>], iteration_bounds = array<i64: 2, 2>, scalar_prefetch = 0 : i64, scratch_operands = 0 : i64, tpu.core_type = #tpu.core_type<tc>, window_params = [{transform_indices = @transform_0, window_bounds = array<i64: 1, 18, 18, 128>}, {pipeline_mode = #tpu.pipeline_mode<synchronous>, transform_indices = @transform_1, window_bounds = array<i64: 1152, 128>}, {pipeline_mode = #tpu.pipeline_mode<synchronous>, transform_indices = @transform_2, window_bounds = array<i64: 1, 128>}, {transform_indices = @transform_3, window_bounds = array<i64: 1, 8, 16, 128>}]} {
    %c8_i32 = arith.constant 8 : i32
    %0 = arith.muli %arg1, %c8_i32 : i32
    %1 = tpu.assume_multiple %0, 8 : i32
    %c0 = arith.constant 0 : index
    %2 = arith.index_cast %1 : i32 to index
    %c0_0 = arith.constant 0 : index
    %c0_1 = arith.constant 0 : index
    %3 = vector.load %arg2[%c0, %2, %c0_0, %c0_1] : memref<1x18x18x128xbf16, #tpu.memory_space<vmem>>, vector<1x10x18x128xbf16>
    %4 = vector.shape_cast %3 : vector<1x10x18x128xbf16> to vector<10x18x128xbf16>
    %5 = vector.extract_strided_slice %4 {offsets = [0, 0, 0], sizes = [8, 16, 128], strides = [1, 1, 1]} : vector<10x18x128xbf16> to vector<8x16x128xbf16>
    %6 = vector.extract_strided_slice %4 {offsets = [0, 1, 0], sizes = [8, 16, 128], strides = [1, 1, 1]} : vector<10x18x128xbf16> to vector<8x16x128xbf16>
    %7 = vector.extract_strided_slice %4 {offsets = [0, 2, 0], sizes = [8, 16, 128], strides = [1, 1, 1]} : vector<10x18x128xbf16> to vector<8x16x128xbf16>
    %8 = vector.extract_strided_slice %4 {offsets = [1, 0, 0], sizes = [8, 16, 128], strides = [1, 1, 1]} : vector<10x18x128xbf16> to vector<8x16x128xbf16>
    %9 = vector.extract_strided_slice %4 {offsets = [1, 1, 0], sizes = [8, 16, 128], strides = [1, 1, 1]} : vector<10x18x128xbf16> to vector<8x16x128xbf16>
    %10 = vector.extract_strided_slice %4 {offsets = [1, 2, 0], sizes = [8, 16, 128], strides = [1, 1, 1]} : vector<10x18x128xbf16> to vector<8x16x128xbf16>
    %11 = vector.extract_strided_slice %4 {offsets = [2, 0, 0], sizes = [8, 16, 128], strides = [1, 1, 1]} : vector<10x18x128xbf16> to vector<8x16x128xbf16>
    %12 = vector.extract_strided_slice %4 {offsets = [2, 1, 0], sizes = [8, 16, 128], strides = [1, 1, 1]} : vector<10x18x128xbf16> to vector<8x16x128xbf16>
    %13 = vector.extract_strided_slice %4 {offsets = [2, 2, 0], sizes = [8, 16, 128], strides = [1, 1, 1]} : vector<10x18x128xbf16> to vector<8x16x128xbf16>
    %14 = tpu.concatenate %5, %6, %7, %8, %9, %10, %11, %12, %13 in 2 : vector<8x16x128xbf16>, vector<8x16x128xbf16>, vector<8x16x128xbf16>, vector<8x16x128xbf16>, vector<8x16x128xbf16>, vector<8x16x128xbf16>, vector<8x16x128xbf16>, vector<8x16x128xbf16>, vector<8x16x128xbf16> -> vector<8x16x1152xbf16>
    %15 = vector.shape_cast %14 : vector<8x16x1152xbf16> to vector<128x1152xbf16>
    %c0_2 = arith.constant 0 : index
    %c0_3 = arith.constant 0 : index
    %16 = vector.load %arg3[%c0_2, %c0_3] : memref<1152x128xbf16, #tpu.memory_space<vmem>>, vector<1152x128xbf16>
    %cst = arith.constant dense<0.000000e+00> : vector<128x128xf32>
    %17 = tpu.matmul %15, %16, %cst {dimension_numbers = #tpu.dot_dimension_numbers<[1], [0], [0], [1], [0, 0, 1, 1], [], []>} : vector<128x1152xbf16>, vector<1152x128xbf16>, vector<128x128xf32> -> vector<128x128xf32>
    %c0_4 = arith.constant 0 : index
    %c0_5 = arith.constant 0 : index
    %18 = vector.load %arg4[%c0_4, %c0_5] : memref<1x128xf32, #tpu.memory_space<vmem>>, vector<1x128xf32>
    %19 = vector.broadcast %18 : vector<1x128xf32> to vector<128x128xf32>
    %20 = arith.addf %17, %19 : vector<128x128xf32>
    %21 = arith.negf %20 : vector<128x128xf32>
    %22 = math.exp %21 : vector<128x128xf32>
    %cst_6 = arith.constant 1.000000e+00 : f32
    %23 = vector.broadcast %cst_6 : f32 to vector<128x128xf32>
    %24 = arith.addf %23, %22 : vector<128x128xf32>
    %25 = arith.divf %23, %24 : vector<128x128xf32>
    %26 = arith.mulf %20, %25 : vector<128x128xf32>
    %27 = vector.shape_cast %26 : vector<128x128xf32> to vector<8x16x128xf32>
    %c0_7 = arith.constant 0 : index
    %c0_8 = arith.constant 0 : index
    %c0_9 = arith.constant 0 : index
    %c0_10 = arith.constant 0 : index
    %28 = vector.load %arg5[%c0_7, %c0_8, %c0_9, %c0_10] : memref<1x8x16x128xf32, #tpu.memory_space<vmem>>, vector<1x8x16x128xf32>
    %29 = vector.shape_cast %28 : vector<1x8x16x128xf32> to vector<8x16x128xf32>
    %30 = vector.shape_cast %27 : vector<8x16x128xf32> to vector<1x8x16x128xf32>
    tpu.vector_store %arg5[%c0_7, %c0_8, %c0_9, %c0_10], %30 {strides = array<i32>} : memref<1x8x16x128xf32, #tpu.memory_space<vmem>>, vector<1x8x16x128xf32>,
    return
  }
  func.func @transform_0(%arg0: i32, %arg1: i32) -> (i32, i32, i32, i32) {
    %c0_i32 = arith.constant 0 : i32
    %c0_i32_0 = arith.constant 0 : i32
    %c0_i32_1 = arith.constant 0 : i32
    %c0_i32_2 = arith.constant 0 : i32
    return %arg0, %c0_i32, %c0_i32_0, %c0_i32_1 : i32, i32, i32, i32
  }
  func.func @transform_1(%arg0: i32, %arg1: i32) -> (i32, i32) {
    %c0_i32 = arith.constant 0 : i32
    %c0_i32_0 = arith.constant 0 : i32
    %c0_i32_1 = arith.constant 0 : i32
    return %c0_i32, %c0_i32_0 : i32, i32
  }
  func.func @transform_2(%arg0: i32, %arg1: i32) -> (i32, i32) {
    %c0_i32 = arith.constant 0 : i32
    %c0_i32_0 = arith.constant 0 : i32
    %c0_i32_1 = arith.constant 0 : i32
    return %c0_i32, %c0_i32_0 : i32, i32
  }
  func.func @transform_3(%arg0: i32, %arg1: i32) -> (i32, i32, i32, i32) {
    %c0_i32 = arith.constant 0 : i32
    %c0_i32_0 = arith.constant 0 : i32
    %c0_i32_1 = arith.constant 0 : i32
    return %arg0, %arg1, %c0_i32, %c0_i32_0 : i32, i32, i32, i32
  }
}

</mosaic_0001>

<bundles_post_ra>
// kernel: tpu_custom_call.1
= control target key start
LH: loop header
LB: loop body
LE: loop exit
PB: predicated region body
PF: predicated region fallthrough
CT: control target
= control target key end

     0   :  { %8 = vsyncpa [#allocation3], 0  ;;  %s3286_s0 = inlined_call_operand.vmem [shape: bf16[2,18,18,128], index: 0, kind: input, shape index: {}]   ;;  %s3287_s1 = inlined_call_operand.vmem [shape: bf16[1152,128], index: 1, kind: input, shape index: {}]   ;;  %s3288_s2 = inlined_call_operand.vmem [shape: f32[1,128], index: 2, kind: input, shape index: {}]   ;;  %s3289_s3 = inlined_call_operand.hbm [shape: f32[2,16,16,128], index: 3, kind: output, shape index: {}]  }
   0x1   :  { %10 = vsyncpa [#allocation3 + $0x1], 0  ;;  %s2569_s12 = smov 0   ;;  %s2571_s13 = smov 0  }
   0x2   :  { %s2573_s14 = smov 0   ;;  %s2575_s15 = smov 0  }
   0x3   :  { %s2577_s16 = smov 0   ;;  %s2579_s17 = smov 0  }
   0x4   :  { %s2581_s18 = smov 0   ;;  %s2583_s19 = smov 0  }
   0x5 LB: > { %s1772_s20 = sadd.s32 4294967295, %s2544_s19   ;;  %s1773_s21 = sadd.s32 4294967294, %s2544_s19   ;;  %s2544_s19 = sphi %s2583_s19, %s16_s19   ;;  %s2540_s18 = sphi %s2581_s18, %s3298_s18   ;;  %s2536_s17 = sphi %s2579_s17, %s3297_s17   ;;  %s2532_s16 = sphi %s2577_s16, %s3296_s16   ;;  %s2528_s15 = sphi %s2575_s15, %s3295_s15   ;;  %s2524_s14 = sphi %s2573_s14, %s3294_s14   ;;  %s2520_s13 = sphi %s2571_s13, %s3293_s13   ;;  %s2516_s12 = sphi %s2569_s12, %s3292_s12  }
   0x6   : > { %s25_s22 = sadd.s32 1, %s2536_s17  ;;  %s28_s23 = sadd.s32 1, %s2540_s18 }
   0x7   : > { %p26_p0 = scmp.ge.s32.totalorder %s25_s22, 2  ;;  %p115_p1 = scmp.ne.s32.totalorder %s2524_s14, %s2520_s13 }
   0x8   : > { %p116_p2 = scmp.eq.s32.totalorder %s1772_s20, 3  ;;  %p121_p5 = scmp.ne.s32.totalorder %s2520_s13, %s2516_s12 }
   0x9   : > { %s3300_s22 = smov (%p26_p0, %s25_s22), 0  ;;  %s3302_s23 = smov (!%p26_p0, %s28_s23), %s2540_s18 }
   0xa   : > { %s101_s24 = ssub.s32 %s2536_s17, %s3300_s22  ;;  %p2620_p3 = por %p116_p2, %p115_p1 }
   0xb   : > { %p30_p4 = scmp.ge.s32.totalorder %s3302_s23, 2  ;;  %p122_p6 = scmp.eq.s32.totalorder %s1773_s21, 3 }
   0xc   : > { %p1776_p7 = scmp.ge.s32.totalorder %s2544_s19, 1  ;;  %p154_p9 = scmp.lt.s32.totalorder %s2544_s19, 5 }
   0xd   : > { %s3304_s23 = smov (%p30_p4, %s3302_s23), 0  ;;  %p2629_p8 = por %p122_p6, %p121_p5 }
   0xe   : > { %s100_s27 = ssub.s32 %s2540_s18, %s3304_s23  ;;  %s105_s28 = sadd.s32 1, %s2524_s14 }
   0xf   : > { %s102_s29 = sor.u32 %s101_s24, %s100_s27  ;;  %p155_p10 = pnand %p1776_p7, %p154_p9 }
  0x10   : > { %p103_p11 = scmp.eq.s32.totalorder %s102_s29, 0  ;;  %v2294_v0 = vld [vmem:[%s3287_s1 + $0x40] sm:$0xff] (!%p155_p10)   ;;  %v2298_v4 = vld [vmem:[%s3287_s1 + $0x48] sm:$0xff] (!%p155_p10)   ;;  %v2302_v8 = vld [vmem:[%s3287_s1 + $0x50] sm:$0xff] (!%p155_p10)   ;;  %p178_p12 = scmp.lt.s32.totalorder (!%p155_p10), %s2532_s16, 1  ;;  %vm396_vm1 = vcmask (!%p155_p10), 1046528  }
  0x11   : > { %158 = sbr.rel (%p155_p10) target bundleno = 464 (0x1d0), region = 32  ;;  %v2295_v1 = vld [vmem:[%s3287_s1 + $0xc0] sm:$0xff] (!%p155_p10)   ;;  %1900 = vmatprep.subr.bf16.mxu0 (!%p155_p10), %v2294_v0  ;;  %v2299_v5 = vld [vmem:[%s3287_s1 + $0xc8] sm:$0xff] (!%p155_p10)   ;;  %v2303_v9 = vld [vmem:[%s3287_s1 + $0xd0] sm:$0xff] (!%p155_p10)   ;;  %vm291_vm0 = vsmask.f32 (!%p155_p10), 7424 }
  0x12   : > { %s2638_s30 = scalar_select %p103_p11, %s2524_s14, %s105_s28  }
  0x13   : > { %v2296_v2 = vld [vmem:[%s3287_s1] sm:$0xff] (!%p155_p10)   ;;  %1964 = vmatprep.subr.bf16.mxu1 (!%p155_p10), %v2295_v1  ;;  %v2300_v6 = vld [vmem:[%s3287_s1 + $0x8] sm:$0xff] (!%p155_p10)   ;;  %v2304_v10 = vld [vmem:[%s3287_s1 + $0x10] sm:$0xff] (!%p155_p10)   ;;  %s1898_s5 = smul.u32 (!%p155_p10), 96, %s2528_s15  ;;  %s1899_s10 = sshll.u32 (!%p155_p10), %s2528_s15, 4 }
  0x14   : > { %v2297_v3 = vld [vmem:[%s3287_s1 + $0x80] sm:$0xff] (!%p155_p10)   ;;  %1901 = vmatpush3.bf16.msra.mxu0 (!%p155_p10), %v2296_v2  ;;  %v2301_v7 = vld [vmem:[%s3287_s1 + $0x88] sm:$0xff] (!%p155_p10)   ;;  %v2305_v11 = vld [vmem:[%s3287_s1 + $0x90] sm:$0xff] (!%p155_p10)   ;;  %s1894_s20 = sshll.u32 (!%p155_p10), %s2532_s16, 5 }
  0x15   : > { %1965 = vmatpush3.bf16.msra.mxu1 (!%p155_p10), %v2297_v3  ;;  %1902 = vmatprep.subr.bf16.mxu0 (!%p155_p10), %v2298_v4  ;;  %v2306_v12 = vld [vmem:[%s3287_s1 + $0x58] sm:$0xff] (!%p155_p10)   ;;  %v2310_v16 = vld [vmem:[%s3287_s1 + $0x60] sm:$0xff] (!%p155_p10)   ;;  %v2314_v20 = vld [vmem:[%s3287_s1 + $0x68] sm:$0xff] (!%p155_p10)   ;;  %s1691_s21 = sadd.s32 (!%p155_p10), %s1899_s10, %s1894_s20 }
  0x16   : > { %1966 = vmatprep.subr.bf16.mxu1 (!%p155_p10), %v2299_v5  ;;  %v2307_v13 = vld [vmem:[%s3287_s1 + $0xd8] sm:$0xff] (!%p155_p10)   ;;  %v2311_v17 = vld [vmem:[%s3287_s1 + $0xe0] sm:$0xff] (!%p155_p10)   ;;  %v2315_v21 = vld [vmem:[%s3287_s1 + $0xe8] sm:$0xff] (!%p155_p10)   ;;  %s1895_s24 = sshll.u32 (!%p155_p10), %s1691_s21, 7 }
  0x17   : > { %v2308_v14 = vld [vmem:[%s3287_s1 + $0x18] sm:$0xff] (!%p155_p10)   ;;  %v2312_v18 = vld [vmem:[%s3287_s1 + $0x20] sm:$0xff] (!%p155_p10)   ;;  %v2316_v22 = vld [vmem:[%s3287_s1 + $0x28] sm:$0xff] (!%p155_p10)   ;;  %s3226_s6 = scalar_lea.hbm (!%p155_p10), %s3289_s3, %s1895_s24 }
  0x18   : > { %1903 = vmatpush3.bf16.msra.mxu0 %v2300_v6  ;;  %v2309_v15 = vld [vmem:[%s3287_s1 + $0x98] sm:$0xff]   ;;  %v2313_v19 = vld [vmem:[%s3287_s1 + $0xa0] sm:$0xff]   ;;  %s179_s28 = scalar_select %p178_p12, %s2532_s16, 1  ;;  %v2317_v23 = vld [vmem:[%s3287_s1 + $0xa8] sm:$0xff]  }
  0x19   : > { %1967 = vmatpush3.bf16.msra.mxu1 %v2301_v7  ;;  %1904 = vmatprep.subr.bf16.mxu0 %v2302_v8  ;;  %v2318_v24 = vld [vmem:[%s3287_s1 + $0x70] sm:$0xff]   ;;  %v2322_v28 = vld [vmem:[%s3287_s1 + $0x78] sm:$0xff]   ;;  %v2329_v40 = vld [vmem:[%s3287_s1 + $0x140] sm:$0xff]  }
  0x1a   : > { %1968 = vmatprep.subr.bf16.mxu1 %v2303_v9  ;;  %s2220_s11 = smul.u32 216, %s179_s28  ;;  %v2319_v25 = vld [vmem:[%s3287_s1 + $0xf0] sm:$0xff]   ;;  %v2323_v29 = vld [vmem:[%s3287_s1 + $0xf8] sm:$0xff]   ;;  %v2330_v43 = vld [vmem:[%s3287_s1 + $0x1c0] sm:$0xff]   ;;  %s175_s28 = sand.u32 1, %s2520_s13  }
  0x1b   : > { %v2320_v26 = vld [vmem:[%s3287_s1 + $0x30] sm:$0xff]   ;;  %v2324_v30 = vld [vmem:[%s3287_s1 + $0x38] sm:$0xff]   ;;  %v2331_v45 = vld [vmem:[%s3287_s1 + $0x100] sm:$0xff]   ;;  %s1777_s8 = sshll.u32 %s175_s28, 7  ;;  %s3234_s15 = scalar_lea.sflag [#allocation3], %s175_s28 }
  0x1c   : > { %1905 = vmatpush3.bf16.msra.mxu0 %v2304_v10  ;;  %v2321_v27 = vld [vmem:[%s3287_s1 + $0xb0] sm:$0xff]   ;;  %s182_s9 = scalar_lea.vmem %s3286_s0, %s2220_s11  ;;  %v2325_v31 = vld [vmem:[%s3287_s1 + $0xb8] sm:$0xff]   ;;  %v2332_v47 = vld [vmem:[%s3287_s1 + $0x180] sm:$0xff]  }
  0x1d   : > { %1969 = vmatpush3.bf16.msra.mxu1 %v2305_v11  ;;  %1906 = vmatprep.subr.bf16.mxu0 %v2306_v12  ;;  %s2739_s4 = scalar_lea.vmem %s182_s9, %s1898_s5  ;;  %v2335_v57 = vld [vmem:[%s3287_s1 + $0x148] sm:$0xff]   ;;  %v2341_v10 = vld [vmem:[%s3287_s1 + $0x150] sm:$0xff]   ;;  %s3190_s9 = scalar_lea.vmem [#allocation2], %s1777_s8 }
  0x1e   : > { %1970 = vmatprep.subr.bf16.mxu1 %v2307_v13  ;;  %v2326_v32 = vld [vmem:[%s2739_s4] sm:$0xff]   ;;  %v2327_v33 = vld [vmem:[%s2739_s4 + $0x8] ss:$0 sps:$4 sm:$0x11]   ;;  %v2328_v34 = vld [vmem:[%s2739_s4 + $0xc] sm:$0xff]   ;;  %s1694_s27 = sshll.u32 %s3190_s9, 4  ;;  %s3228_s27 = int_to_ptr.vmem [resolvable:$true] %s1694_s27 }
  0x1f   : > { %v293_v35 = vshrl.u32 %v2326_v32, 16  ;;  %v295_v36 = vshll.u32 %v2326_v32, 16  ;;  %v300_v37 = vshll.u32 %v2327_v33, 16  ;;  %v397_v38 = vrot.slane %v2326_v32, 1  ;;  %1193 = vmatprep.mubr.bf16.mxu1 %v2328_v34  ;;  %v2763_v52 = vld [vmem:[%s2739_s4 + $0x18] sm:$0xff]   ;;  %v2336_v58 = vld [vmem:[%s3287_s1 + $0x1c8] sm:$0xff]  }
  0x20   : > { %1907 = vmatpush3.bf16.msra.mxu0 %v2308_v14  ;;  %v398_v39 = vrot.slane %v2327_v33, 1  ;;  %v305_v48 = vshrl.u32 %v2328_v34, 16  ;;  %v2333_v49 = vld [vmem:[%s2739_s4 + $0x14] ss:$0 sps:$4 sm:$0x11]   ;;  %v307_v50 = vshll.u32 %v2328_v34, 16 }
  0x21   : > { %1971 = vmatpush3.bf16.msra.mxu1 %v2309_v15  ;;  %1908 = vmatprep.subr.bf16.mxu0 %v2310_v16  ;;  %v297_v41 = vrot.slane %v295_v36, 1  ;;  %v302_v42 = vrot.slane %v300_v37, 1  ;;  %v400_v53 = vrot.slane %v2328_v34, 1  ;;  %v312_v55 = vshll.u32 %v2333_v49, 16  ;;  %v2337_v63 = vld [vmem:[%s3287_s1 + $0x108] sm:$0xff]   ;;  %v2342_v13 = vld [vmem:[%s3287_s1 + $0x1d0] sm:$0xff]  }
  0x22   : > { %1972 = vmatprep.subr.bf16.mxu1 %v2311_v17  ;;  %v399_v44 = vsel %vm396_vm1, %v397_v38, %v398_v39  ;;  %v309_v54 = vrot.slane %v307_v50, 1  ;;  %v401_v56 = vrot.slane %v2333_v49, 1  ;;  %v317_v59 = vshrl.u32 %v2763_v52, 16  ;;  %v2338_v0 = vld [vmem:[%s3287_s1 + $0x188] sm:$0xff]   ;;  %v2343_v14 = vld [vmem:[%s3287_s1 + $0x110] sm:$0xff]   ;;  %s2450_s16 = scalar_lea.vmem %s3228_s27, 2048 }
  0x23   : > { %v298_v46 = vor.u32 %v297_v41, %v293_v35  ;;  %v314_v61 = vrot.slane %v312_v55, 1  ;;  %v319_v1 = vshll.u32 %v2763_v52, 16  ;;  %v2339_v3 = vld [vmem:[%s2739_s4 + $0x20] ss:$0 sps:$4 sm:$0x11]   ;;  %v2788_v4 = vld [vmem:[%s2739_s4 + $0x24] sm:$0xff]   ;;  %p2451_p13 = scmp.ne.s32.totalorder %s3228_s27, %s2450_s16 }
  0x24   : > { %1909 = vmatpush3.bf16.msra.mxu0 %v2312_v18  ;;  %v310_v60 = vor.u32 %v309_v54, %v305_v48  ;;  %v2774_v62 = vsel %vm396_vm1, %v400_v53, %v401_v56  ;;  %v403_v6 = vrot.slane %v2763_v52, 1  ;;  %v324_v7 = vshll.u32 %v2339_v3, 16  ;;  %v2344_v18 = vld [vmem:[%s3287_s1 + $0x190] sm:$0xff]   ;;  %v2351_v33 = vld [vmem:[%s2739_s4 + $0x38] ss:$0 sps:$4 sm:$0x11]  }
  0x25   : > { %1973 = vmatpush3.bf16.msra.mxu1 %v2313_v19  ;;  %1910 = vmatprep.subr.bf16.mxu0 %v2314_v20  ;;  %v303_v51 = vsel %vm291_vm0, %v298_v46, %v302_v42  ;;  %v321_v5 = vrot.slane %v319_v1, 1  ;;  %v404_v8 = vrot.slane %v2339_v3, 1  ;;  %v329_v11 = vshrl.u32 %v2788_v4, 16  ;;  %v2345_v19 = vld [vmem:[%s2739_s4 + $0x2c] ss:$0 sps:$4 sm:$0x11]   ;;  %p2452_p0 = pnand %p2451_p13, %p2620_p3 }
  0x26   : > { %1974 = vmatprep.subr.bf16.mxu1 %v2315_v21  ;;  %1096 = vmatprep.mubr.bf16.mxu0 %v303_v51  ;;  %v2784_v2 = vsel %vm291_vm0, %v310_v60, %v314_v61  ;;  %v326_v12 = vrot.slane %v324_v7, 1  ;;  %v331_v15 = vshll.u32 %v2788_v4, 16  ;;  %v2817_v21 = vld [vmem:[%s2739_s4 + $0x30] sm:$0xff]   ;;  %v2842_v35 = vld [vmem:[%s2739_s4 + $0x3c] sm:$0xff]   ;;  %v348_v37 = vshll.u32 %v2351_v33, 16  ;;  %v2870_v53 = vld [vmem:[%s2739_s4 + $0x48] sm:$0xff]  }
  0x27   : > { %v322_v9 = vor.u32 %v321_v5, %v317_v59  ;;  %v2809_v17 = vsel %vm396_vm1, %v403_v6, %v404_v8  ;;  %v409_v38 = vrot.slane %v2817_v21, 1  ;;  %v410_v39 = vrot.slane %v2351_v33, 1  ;;  %v2354_v42 = vld [vmem:[%s3287_s1 + $0x1e0] sm:$0xff]   ;;  %v2359_v55 = vld [vmem:[%s3287_s1 + $0x168] sm:$0xff]   ;;  %v2896_v6 = vld [vmem:[%s2739_s4 + $0x54] sm:$0xff]   ;;  %p2453_p1 = pneg %p2452_p0  ;;  %s2546_s5 = smov [#allocation2]  }
  0x28   : > { %1911 = vmatpush3.bf16.msra.mxu0 %v2316_v22  ;;  %v333_v20 = vrot.slane %v331_v15, 1  ;;  %v336_v22 = vshll.u32 %v2345_v19, 16  ;;  %v2356_v46 = vld [vmem:[%s3287_s1 + $0x1a0] sm:$0xff]   ;;  %v353_v49 = vshrl.u32 %v2842_v35, 16  ;;  %v355_v50 = vshll.u32 %v2842_v35, 16  ;;  %v2361_v61 = vld [vmem:[%s3287_s1 + $0x128] sm:$0xff]  }
  0x29   : > { %1975 = vmatpush3.bf16.msra.mxu1 %v2317_v23  ;;  %1912 = vmatprep.subr.bf16.mxu0 %v2318_v24  ;;  %v2806_v16 = vsel %vm291_vm0, %v322_v9, %v326_v12  ;;  %v406_v23 = vrot.slane %v2788_v4, 1  ;;  %v407_v24 = vrot.slane %v2345_v19, 1  ;;  %v2878_v56 = vsel %vm396_vm1, %v409_v38, %v410_v39  ;;  %v2363_v3 = vld [vmem:[%s2739_s4 + $0x50] ss:$0 sps:$4 sm:$0x11]   ;;  %v2374_v33 = vld [vmem:[%s3287_s1 + $0x1b8] sm:$0xff]  }
  0x2a   : > { %1976 = vmatprep.subr.bf16.mxu1 %v2319_v25  ;;  %v2347_v25 = vld [vmem:[%s3287_s1 + $0x158] sm:$0xff]   ;;  %v357_v54 = vrot.slane %v355_v50, 1  ;;  %v365_v5 = vshrl.u32 %v2870_v53, 16  ;;  %v372_v9 = vshll.u32 %v2363_v3, 16  ;;  %v2367_v12 = vld [vmem:[%s3287_s1 + $0x130] sm:$0xff]  }
  0x2b   : > { %v2846_v36 = vsel %vm396_vm1, %v406_v23, %v407_v24  ;;  %v2368_v15 = vld [vmem:[%s3287_s1 + $0x1b0] sm:$0xff]   ;;  %v2369_v19 = vld [vmem:[%s2739_s4 + $0x5c] ss:$0 sps:$4 sm:$0x11]   ;;  %v416_v23 = vrot.slane %v2363_v3, 1  ;;  %v377_v24 = vshrl.u32 %v2896_v6, 16 }
  0x2c   : > { %1913 = vmatpush3.bf16.msra.mxu0 %v2320_v26  ;;  %v334_v26 = vor.u32 %v333_v20, %v329_v11  ;;  %v358_v59 = vor.u32 %v357_v54, %v353_v49  ;;  %v2366_v11 = vld [vmem:[%s3287_s1 + $0x1f0] sm:$0xff]   ;;  %v379_v20 = vshll.u32 %v2896_v6, 16 }
  0x2d   : > { %1977 = vmatpush3.bf16.msra.mxu1 %v2321_v27  ;;  %1914 = vmatprep.subr.bf16.mxu0 %v2322_v28  ;;  %v338_v27 = vrot.slane %v336_v22, 1  ;;  %v2348_v28 = vld [vmem:[%s3287_s1 + $0x1d8] sm:$0xff]   ;;  %v415_v22 = vrot.slane %v2870_v53, 1 }
  0x2e   : > { %1978 = vmatprep.subr.bf16.mxu1 %v2323_v29  ;;  %v2349_v29 = vld [vmem:[%s3287_s1 + $0x118] sm:$0xff]  }
  0x2f   : > { %v2949_v38 = vsel %vm396_vm1, %v415_v22, %v416_v23 }
  0x30   : > { %1915 = vmatpush3.bf16.msra.mxu0 %v2324_v30  ;;  %v341_v30 = vshrl.u32 %v2817_v21, 16 }
  0x31   : > { %1979 = vmatpush3.bf16.msra.mxu1 %v2325_v31  ;;  %2028 = vmatprep.subr.bf16.mxu0 %v2329_v40  ;;  %v2833_v31 = vsel %vm291_vm0, %v334_v26, %v338_v27  ;;  %v2353_v40 = vld [vmem:[%s3287_s1 + $0x160] sm:$0xff]   ;;  %v2371_v26 = vld [vmem:[%s3287_s1 + $0x178] sm:$0xff]   ;;  %v381_v27 = vrot.slane %v379_v20, 1 }
  0x32   : > { %2092 = vmatprep.subr.bf16.mxu1 %v2330_v43  ;;  %v350_v43 = vrot.slane %v348_v37, 1 }
  0x33   : > { %1097 = vmatmul.mubr.bf16.vlgmr.msra.gmra.mrb[0].mxu0 %v2326_v32  ;;  %v2350_v32 = vld [vmem:[%s3287_s1 + $0x198] sm:$0xff]   ;;  %v382_v39 = vor.u32 %v381_v27, %v377_v24 }
  0x34   : > { %1194 = vmatmul.mubr.bf16.vlgmr.msra.gmra.mrb[0].mxu1 %v399_v44  ;;  %2029 = vmatpush3.bf16.msra.mxu0 %v2331_v45  ;;  %v2355_v44 = vld [vmem:[%s3287_s1 + $0x120] sm:$0xff]  }
  0x35   : > { %2093 = vmatpush3.bf16.msra.mxu1 %v2332_v47  ;;  %1201 = vmatprep.mubr.bf16.mxu1 %v2763_v52  ;;  %v2357_v47 = vld [vmem:[%s2739_s4 + $0x44] ss:$0 sps:$4 sm:$0x11]  }
  0x36   : > { %2030 = vmatprep.subr.bf16.mxu0 %v2335_v57  ;;  %2094 = vmatprep.subr.bf16.mxu1 %v2336_v58  ;;  %v360_v51 = vshll.u32 %v2357_v47, 16  ;;  %v412_v57 = vrot.slane %v2842_v35, 1  ;;  %v2360_v58 = vld [vmem:[%s3287_s1 + $0x1e8] sm:$0xff]   ;;  %v413_v1 = vrot.slane %v2357_v47, 1 }
  0x37   : > { %1104 = vmatprep.mubr.bf16.mxu0 %v2784_v2 }
  0x38   : > { %2031 = vmatpush3.bf16.msra.mxu0 %v2337_v63  ;;  %v362_v60 = vrot.slane %v360_v51, 1  ;;  %v2362_v63 = vld [vmem:[%s3287_s1 + $0x1a8] sm:$0xff]  }
  0x39   : > { %2095 = vmatpush3.bf16.msra.mxu1 %v2338_v0  ;;  %2032 = vmatprep.subr.bf16.mxu0 %v2341_v10  ;;  %v367_v0 = vshll.u32 %v2870_v53, 16  ;;  %v2365_v10 = vld [vmem:[%s3287_s1 + $0x170] sm:$0xff]  }
  0x3a   : > { %2096 = vmatprep.subr.bf16.mxu1 %v2342_v13  ;;  %v2899_v7 = vsel %vm291_vm0, %v358_v59, %v362_v60  ;;  %v2913_v13 = vsel %vm396_vm1, %v412_v57, %v413_v1  ;;  %v2384_v57 = vld [vmem:[%s2739_s4 + $0x74] ss:$0 sps:$4 sm:$0x11]  }
  0x3b   : > { %1105 = vmatmul.mubr.bf16.gmra.mrb[4].mxu0 %v2328_v34  ;;  %v343_v34 = vshll.u32 %v2817_v21, 16  ;;  %v369_v8 = vrot.slane %v367_v0, 1  ;;  %v478_v3 = vrot.slane %v2384_v57, 1 }
  0x3c   : > { %1202 = vmatmul.mubr.bf16.gmra.mrb[4].mxu1 %v2774_v62  ;;  %1112 = vmatprep.mubr.bf16.mxu0 %v2806_v16 }
  0x3d   : > { %1209 = vmatprep.mubr.bf16.mxu1 %v2788_v4  ;;  %2033 = vmatpush3.bf16.msra.mxu0 %v2343_v14  ;;  %v345_v41 = vrot.slane %v343_v34, 1  ;;  %v374_v14 = vrot.slane %v372_v9, 1  ;;  %v2375_v34 = vld [vmem:[%s3287_s1 + $0x200] sm:$0xff]  }
  0x3e   : > { %2097 = vmatpush3.bf16.msra.mxu1 %v2344_v18  ;;  %2034 = vmatprep.subr.bf16.mxu0 %v2347_v25  ;;  %v370_v18 = vor.u32 %v369_v8, %v365_v5  ;;  %v2924_v25 = vld [vmem:[%s2739_s4 + $0x60] sm:$0xff]  }
  0x3f   : > { %2098 = vmatprep.subr.bf16.mxu1 %v2348_v28  ;;  %v346_v45 = vor.u32 %v345_v41, %v341_v30  ;;  %v2372_v28 = vld [vmem:[%s3287_s1 + $0x1f8] sm:$0xff]   ;;  %v384_v30 = vshll.u32 %v2369_v19, 16  ;;  %v441_v37 = vshll.u32 %v2924_v25, 16  ;;  %v439_v41 = vshrl.u32 %v2924_v25, 16 }
  0x40   : > { %v451_v47 = vrot.slane %v2924_v25, 1 }
  0x41   : > { %2035 = vmatpush3.bf16.msra.mxu0 %v2349_v29  ;;  %v2865_v48 = vsel %vm291_vm0, %v346_v45, %v350_v43  ;;  %v2934_v29 = vsel %vm291_vm0, %v370_v18, %v374_v14  ;;  %v418_v43 = vrot.slane %v2896_v6, 1  ;;  %v2377_v14 = vld [vmem:[%s3287_s1 + $0x210] sm:$0xff]  }
  0x42   : > { %2099 = vmatpush3.bf16.msra.mxu1 %v2350_v32  ;;  %2036 = vmatprep.subr.bf16.mxu0 %v2353_v40  ;;  %v2373_v32 = vld [vmem:[%s3287_s1 + $0x138] sm:$0xff]   ;;  %v386_v40 = vrot.slane %v384_v30, 1 }
  0x43   : > { %1113 = vmatmul.mubr.bf16.gmra.mrb[8].mxu0 %v2763_v52  ;;  %2100 = vmatprep.subr.bf16.mxu1 %v2354_v42  ;;  %v443_v42 = vrot.slane %v441_v37, 1 }
  0x44   : > { %1210 = vmatmul.mubr.bf16.gmra.mrb[8].mxu1 %v2809_v17  ;;  %1120 = vmatprep.mubr.bf16.mxu0 %v2833_v31  ;;  %v2956_v45 = vsel %vm291_vm0, %v382_v39, %v386_v40 }
  0x45   : > { %1217 = vmatprep.mubr.bf16.mxu1 %v2817_v21  ;;  %2037 = vmatpush3.bf16.msra.mxu0 %v2355_v44  ;;  %v419_v44 = vrot.slane %v2369_v19, 1  ;;  %v444_v49 = vor.u32 %v443_v42, %v439_v41 }
  0x46   : > { %2101 = vmatpush3.bf16.msra.mxu1 %v2356_v46  ;;  %2038 = vmatprep.subr.bf16.mxu0 %v2359_v55  ;;  %v2381_v46 = vld [vmem:[%s2739_s4 + $0x68] ss:$0 sps:$4 sm:$0x11]   ;;  %v2966_v55 = vld [vmem:[%s2739_s4 + $0x6c] sm:$0xff]   ;;  %s2454_s4 = sshll.u32 %s2546_s5, 4  ;;  %s2455_s4 = int_to_ptr.vmem [resolvable:$false] %s2454_s4 }
  0x47   : > { %2102 = vmatprep.subr.bf16.mxu1 %v2360_v58  ;;  %v446_v50 = vshll.u32 %v2381_v46, 16  ;;  %v452_v51 = vrot.slane %v2381_v46, 1  ;;  %v2963_v54 = vsel %vm396_vm1, %v418_v43, %v419_v44  ;;  %v465_v60 = vshrl.u32 %v2966_v55, 16  ;;  %s2456_s7 = scalar_lea.vmem %s2455_s4, 4096  ;;  %p2457_p2 = scmp.lt.s32.totalorder %s3228_s27, %s2455_s4 }
  0x48   : > { %v477_v0 = vrot.slane %v2966_v55, 1  ;;  %p2458_p4 = scmp.lt.s32.totalorder %s2456_s7, %s2450_s16 }
  0x49   : > { %2039 = vmatpush3.bf16.msra.mxu0 %v2361_v61  ;;  %v448_v58 = vrot.slane %v446_v50, 1  ;;  %v2970_v59 = vsel %vm396_vm1, %v451_v47, %v452_v51  ;;  %v467_v61 = vshll.u32 %v2966_v55, 16 }
  0x4a   : > { %2103 = vmatpush3.bf16.msra.mxu1 %v2362_v63  ;;  %2040 = vmatprep.subr.bf16.mxu0 %v2365_v10  ;;  %v472_v63 = vshll.u32 %v2384_v57, 16  ;;  %v2981_v9 = vsel %vm396_vm1, %v477_v0, %v478_v3  ;;  %p2459_p5 = por %p2458_p4, %p2457_p2 }
  0x4b   : > { %1121 = vmatmul.mubr.bf16.gmra.mrb[12].mxu0 %v2788_v4  ;;  %2104 = vmatprep.subr.bf16.mxu1 %v2366_v11  ;;  %v2977_v1 = vsel %vm291_vm0, %v444_v49, %v448_v58  ;;  %v469_v5 = vrot.slane %v467_v61, 1 }
  0x4c   : > { %1218 = vmatmul.mubr.bf16.gmra.mrb[12].mxu1 %v2846_v36  ;;  %1128 = vmatprep.mubr.bf16.mxu0 %v2865_v48  ;;  %v474_v8 = vrot.slane %v472_v63, 1  ;;  %p2460_p6 = pnand %p2459_p5, %p2453_p1 }
  0x4d   : > { %1225 = vmatprep.mubr.bf16.mxu1 %v2842_v35  ;;  %2041 = vmatpush3.bf16.msra.mxu0 %v2367_v12  ;;  %v470_v10 = vor.u32 %v469_v5, %v465_v60  ;;  %v2376_v12 = vld [vmem:[%s3287_s1 + $0x208] sm:$0xff]  }
  0x4e   : > { %2105 = vmatpush3.bf16.msra.mxu1 %v2368_v15  ;;  %2042 = vmatprep.subr.bf16.mxu0 %v2371_v26 }
  0x4f   : > { %2106 = vmatprep.subr.bf16.mxu1 %v2372_v28  ;;  %v475_v11 = vsel %vm291_vm0, %v470_v10, %v474_v8 }
  0x51   : > { %2043 = vmatpush3.bf16.msra.mxu0 %v2373_v32 }
  0x52   : > { %2107 = vmatpush3.bf16.msra.mxu1 %v2374_v33  ;;  %2172 = vmatprep.subr.bf16.mxu0 %v2375_v34 }
  0x53   : > { %1129 = vmatmul.mubr.bf16.gmra.mrb[16].mxu0 %v2817_v21  ;;  %2204 = vmatprep.subr.bf16.mxu1 %v2375_v34 }
  0x54   : > { %1226 = vmatmul.mubr.bf16.gmra.mrb[16].mxu1 %v2878_v56  ;;  %1136 = vmatprep.mubr.bf16.mxu0 %v2899_v7 }
  0x55   : > { %1233 = vmatprep.mubr.bf16.mxu1 %v2870_v53 }
  0x5b   : > { %1137 = vmatmul.mubr.bf16.gmra.mrb[20].mxu0 %v2842_v35 }
  0x5c   : > { %1234 = vmatmul.mubr.bf16.gmra.mrb[20].mxu1 %v2913_v13  ;;  %1144 = vmatprep.mubr.bf16.mxu0 %v2934_v29 }
  0x5d   : > { %1241 = vmatprep.mubr.bf16.mxu1 %v2896_v6 }
  0x63   : > { %1145 = vmatmul.mubr.bf16.gmra.mrb[24].mxu0 %v2870_v53 }
  0x64   : > { %1242 = vmatmul.mubr.bf16.gmra.mrb[24].mxu1 %v2949_v38  ;;  %1152 = vmatprep.mubr.bf16.mxu0 %v2956_v45 }
  0x65   : > { %1249 = vmatprep.mubr.bf16.mxu1 %v2924_v25 }
  0x6b   : > { %1153 = vmatmul.mubr.bf16.gmra.mrb[28].mxu0 %v2896_v6 }
  0x6c   : > { %1250 = vmatmul.mubr.bf16.gmra.mrb[28].mxu1 %v2963_v54  ;;  %1290 = vmatprep.mubr.bf16.mxu0 %v2774_v62  ;;  %v2379_v62 = vld [vmem:[%s3287_s1 + $0x220] sm:$0xff]  }
  0x6d   : > { %1387 = vmatprep.mubr.bf16.mxu1 %v2806_v16 }
  0x73   : > { %1291 = vmatmul.mubr.bf16.vlgmr.msra.gmra.mrb[32].mxu0 %v2784_v2  ;;  %v2380_v2 = vld [vmem:[%s3287_s1 + $0x228] sm:$0xff]  }
  0x74   : > { %1388 = vmatmul.mubr.bf16.vlgmr.msra.gmra.mrb[32].mxu1 %v2763_v52  ;;  %2173 = vmatpush3.bf16.msra.mxu0 %v2375_v34  ;;  %v2378_v52 = vld [vmem:[%s3287_s1 + $0x218] sm:$0xff]  }
  0x75   : > { %2212 = vmatpush3.bf16.msra.mxu1 %v2375_v34  ;;  %1395 = vmatprep.mubr.bf16.mxu1 %v2833_v31 }
  0x76   : > { %2205 = vmatprep.subr.bf16.mxu1 %v2376_v12  ;;  %1298 = vmatprep.mubr.bf16.mxu0 %v2809_v17 }
  0x77   : > { %2174 = vmatprep.subr.bf16.mxu0 %v2376_v12 }
  0x78   : > { %2175 = vmatpush3.bf16.msra.mxu0 %v2376_v12 }
  0x79   : > { %2213 = vmatpush3.bf16.msra.mxu1 %v2376_v12  ;;  %2176 = vmatprep.subr.bf16.mxu0 %v2377_v14 }
  0x7a   : > { %2206 = vmatprep.subr.bf16.mxu1 %v2377_v14 }
  0x7b   : > { %1299 = vmatmul.mubr.bf16.gmra.mrb[36].mxu0 %v2806_v16  ;;  %v2385_v16 = vld [vmem:[%s3287_s1 + $0x238] sm:$0xff]  }
  0x7c   : > { %1396 = vmatmul.mubr.bf16.gmra.mrb[36].mxu1 %v2788_v4  ;;  %1306 = vmatprep.mubr.bf16.mxu0 %v2846_v36  ;;  %v2382_v4 = vld [vmem:[%s3287_s1 + $0x230] sm:$0xff]  }
  0x7d   : > { %1403 = vmatprep.mubr.bf16.mxu1 %v2865_v48  ;;  %2214 = vmatpush3.bf16.msra.mxu1 %v2377_v14 }
  0x7e   : > { %2207 = vmatprep.subr.bf16.mxu1 %v2378_v52  ;;  %2177 = vmatpush3.bf16.msra.mxu0 %v2377_v14 }
  0x7f   : > { %2178 = vmatprep.subr.bf16.mxu0 %v2378_v52 }
  0x81   : > { %2215 = vmatpush3.bf16.msra.mxu1 %v2378_v52 }
  0x82   : > { %2208 = vmatprep.subr.bf16.mxu1 %v2379_v62  ;;  %2179 = vmatpush3.bf16.msra.mxu0 %v2378_v52 }
  0x83   : > { %2180 = vmatprep.subr.bf16.mxu0 %v2379_v62  ;;  %1307 = vmatmul.mubr.bf16.gmra.mrb[40].mxu0 %v2833_v31 }
  0x84   : > { %1404 = vmatmul.mubr.bf16.gmra.mrb[40].mxu1 %v2817_v21  ;;  %1314 = vmatprep.mubr.bf16.mxu0 %v2878_v56 }
  0x85   : > { %1411 = vmatprep.mubr.bf16.mxu1 %v2899_v7  ;;  %2216 = vmatpush3.bf16.msra.mxu1 %v2379_v62 }
  0x86   : > { %2209 = vmatprep.subr.bf16.mxu1 %v2380_v2  ;;  %2181 = vmatpush3.bf16.msra.mxu0 %v2379_v62 }
  0x87   : > { %2182 = vmatprep.subr.bf16.mxu0 %v2380_v2 }
  0x89   : > { %2217 = vmatpush3.bf16.msra.mxu1 %v2380_v2 }
  0x8a   : > { %2210 = vmatprep.subr.bf16.mxu1 %v2382_v4  ;;  %2183 = vmatpush3.bf16.msra.mxu0 %v2380_v2 }
  0x8b   : > { %2184 = vmatprep.subr.bf16.mxu0 %v2382_v4  ;;  %1315 = vmatmul.mubr.bf16.gmra.mrb[44].mxu0 %v2865_v48 }
  0x8c   : > { %1412 = vmatmul.mubr.bf16.gmra.mrb[44].mxu1 %v2842_v35  ;;  %1322 = vmatprep.mubr.bf16.mxu0 %v2913_v13 }
  0x8d   : > { %1419 = vmatprep.mubr.bf16.mxu1 %v2934_v29  ;;  %2218 = vmatpush3.bf16.msra.mxu1 %v2382_v4 }
  0x8e   : > { %2211 = vmatprep.subr.bf16.mxu1 %v2385_v16  ;;  %2185 = vmatpush3.bf16.msra.mxu0 %v2382_v4 }
  0x8f   : > { %2186 = vmatprep.subr.bf16.mxu0 %v2385_v16 }
  0x91   : > { %2219 = vmatpush3.bf16.msra.mxu1 %v2385_v16 }
  0x92   : > { %2187 = vmatpush3.bf16.msra.mxu0 %v2385_v16 }
  0x93   : > { %1323 = vmatmul.mubr.bf16.gmra.mrb[48].mxu0 %v2899_v7 }
  0x94   : > { %1420 = vmatmul.mubr.bf16.gmra.mrb[48].mxu1 %v2870_v53  ;;  %1330 = vmatprep.mubr.bf16.mxu0 %v2949_v38 }
  0x95   : > { %1427 = vmatprep.mubr.bf16.mxu1 %v2956_v45 }
  0x9b   : > { %1331 = vmatmul.mubr.bf16.gmra.mrb[52].mxu0 %v2934_v29 }
  0x9c   : > { %1428 = vmatmul.mubr.bf16.gmra.mrb[52].mxu1 %v2896_v6  ;;  %1338 = vmatprep.mubr.bf16.mxu0 %v2963_v54 }
  0x9d   : > { %1435 = vmatprep.mubr.bf16.mxu1 %v2977_v1 }
  0xa3   : > { %1339 = vmatmul.mubr.bf16.gmra.mrb[56].mxu0 %v2956_v45 }
  0xa4   : > { %1436 = vmatmul.mubr.bf16.gmra.mrb[56].mxu1 %v2924_v25  ;;  %1346 = vmatprep.mubr.bf16.mxu0 %v2970_v59 }
  0xa5   : > { %1443 = vmatprep.mubr.bf16.mxu1 %v475_v11 }
  0xab   : > { %1347 = vmatmul.mubr.bf16.gmra.mrb[60].mxu0 %v2977_v1 }
  0xac   : > { %1444 = vmatmul.mubr.bf16.gmra.mrb[60].mxu1 %v2966_v55  ;;  %2188 = vmatprep.mubr.bf16.mxu0 %v2809_v17  ;;  %v3047_v17 = vld [vmem:[%s3288_s2] ss:$0 sm:$0xff] }
  0xad   : > { %2196 = vmatprep.mubr.bf16.mxu1 %v2949_v38 }
  0xb3   : > { %2189 = vmatmul.mubr.bf16.vlgmr.msra.gmra.mrb[64].mxu0 %v2846_v36 }
  0xb4   : > { %2197 = vmatmul.mubr.bf16.vlgmr.msra.gmra.mrb[64].mxu1 %v2963_v54  ;;  %2192 = vmatprep.mubr.bf16.mxu0 %v2878_v56 }
  0xb5   : > { %2200 = vmatprep.mubr.bf16.mxu1 %v2970_v59 }
  0xbb   : > { %2193 = vmatmul.mubr.bf16.gmra.mrb[68].mxu0 %v2913_v13 }
  0xbc   : > { %2201 = vmatmul.mubr.bf16.gmra.mrb[68].mxu1 %v2981_v9 }
 0x106   : > { %v1916_v6 = vpop.f32.mrb[0].mxu0 }
 0x107   : > { %v1980_v21 = vpop.f32.mrb[0].mxu1  ;;  %v1917_v15 = vpop.f32.mrb[1].mxu0 }
 0x108   : > { %v1981_v31 = vpop.f32.mrb[1].mxu1  ;;  %v1918_v36 = vadd.f32 %v1917_v15, %v1916_v6  ;;  %v1919_v18 = vpop.f32.mrb[2].mxu0 }
 0x109   : > { %v1982_v35 = vadd.f32 %v1981_v31, %v1980_v21  ;;  %v1983_v48 = vpop.f32.mrb[2].mxu1  ;;  %v1920_v56 = vpop.f32.mrb[3].mxu0 }
 0x10a   : > { %v1984_v53 = vpop.f32.mrb[3].mxu1  ;;  %v1099_v19 = vadd.f32 %v1918_v36, %v3047_v17  ;;  %v1921_v20 = vadd.f32 %v1920_v56, %v1919_v18 }
 0x10b   : > { %v1985_v7 = vadd.f32 %v1984_v53, %v1983_v48 }
 0x10c   : > { %v3050_v23 = vadd.f32 %v1982_v35, %v1099_v19  ;;  %v1102_v24 = vadd.f32 %v1921_v20, %v3047_v17 }
 0x10e   : > { %v3053_v28 = vadd.f32 %v1985_v7, %v1102_v24  ;;  %v1922_v29 = vpop.f32.mrb[4].mxu0 }
 0x10f   : > { %v1986_v13 = vpop.f32.mrb[4].mxu1  ;;  %v1923_v32 = vpop.f32.mrb[5].mxu0 }
 0x110   : > { %v1987_v22 = vpop.f32.mrb[5].mxu1  ;;  %v1924_v33 = vadd.f32 %v1923_v32, %v1922_v29  ;;  %v1925_v34 = vpop.f32.mrb[6].mxu0 }
 0x111   : > { %v1988_v25 = vadd.f32 %v1987_v22, %v1986_v13  ;;  %v1989_v26 = vpop.f32.mrb[6].mxu1  ;;  %v1926_v37 = vpop.f32.mrb[7].mxu0 }
 0x112   : > { %v1990_v27 = vpop.f32.mrb[7].mxu1  ;;  %v1107_v38 = vadd.f32 %v1924_v33, %v3047_v17  ;;  %v1927_v39 = vadd.f32 %v1926_v37, %v1925_v34 }
 0x113   : > { %v1991_v30 = vadd.f32 %v1990_v27, %v1989_v26 }
 0x114   : > { %v3056_v42 = vadd.f32 %v1988_v25, %v1107_v38  ;;  %v1110_v43 = vadd.f32 %v1927_v39, %v3047_v17 }
 0x116   : > { %v3059_v47 = vadd.f32 %v1991_v30, %v1110_v43  ;;  %v1928_v49 = vpop.f32.mrb[8].mxu0 }
 0x117   : > { %v1992_v40 = vpop.f32.mrb[8].mxu1  ;;  %v1929_v51 = vpop.f32.mrb[9].mxu0 }
 0x118   : > { %v1993_v41 = vpop.f32.mrb[9].mxu1  ;;  %v1930_v54 = vadd.f32 %v1929_v51, %v1928_v49  ;;  %v1931_v55 = vpop.f32.mrb[10].mxu0 }
 0x119   : > { %v1994_v44 = vadd.f32 %v1993_v41, %v1992_v40  ;;  %v1995_v45 = vpop.f32.mrb[10].mxu1  ;;  %v1932_v57 = vpop.f32.mrb[11].mxu0 }
 0x11a   : > { %v1996_v46 = vpop.f32.mrb[11].mxu1  ;;  %v1115_v58 = vadd.f32 %v1930_v54, %v3047_v17  ;;  %v1933_v59 = vadd.f32 %v1932_v57, %v1931_v55 }
 0x11b   : > { %v1997_v50 = vadd.f32 %v1996_v46, %v1995_v45 }
 0x11c   : > { %v3062_v63 = vadd.f32 %v1994_v44, %v1115_v58  ;;  %v1118_v0 = vadd.f32 %v1933_v59, %v3047_v17 }
 0x11e   : > { %v3065_v8 = vadd.f32 %v1997_v50, %v1118_v0  ;;  %v1934_v9 = vpop.f32.mrb[12].mxu0 }
 0x11f   : > { %v1998_v60 = vpop.f32.mrb[12].mxu1  ;;  %v1935_v11 = vpop.f32.mrb[13].mxu0 }
 0x120   : > { %v1999_v61 = vpop.f32.mrb[13].mxu1  ;;  %v1936_v12 = vadd.f32 %v1935_v11, %v1934_v9  ;;  %v1937_v14 = vpop.f32.mrb[14].mxu0 }
 0x121   : > { %v2000_v1 = vadd.f32 %v1999_v61, %v1998_v60  ;;  %v2001_v3 = vpop.f32.mrb[14].mxu1  ;;  %v1938_v52 = vpop.f32.mrb[15].mxu0 }
 0x122   : > { %v2002_v5 = vpop.f32.mrb[15].mxu1  ;;  %v1123_v62 = vadd.f32 %v1936_v12, %v3047_v17  ;;  %v1939_v2 = vadd.f32 %v1938_v52, %v1937_v14 }
 0x123   : > { %v2003_v10 = vadd.f32 %v2002_v5, %v2001_v3 }
 0x124   : > { %v3068_v21 = vadd.f32 %v2000_v1, %v1123_v62  ;;  %v1126_v31 = vadd.f32 %v1939_v2, %v3047_v17 }
 0x126   : > { %v3071_v6 = vadd.f32 %v2003_v10, %v1126_v31  ;;  %v1940_v7 = vpop.f32.mrb[16].mxu0 }
 0x127   : > { %v2004_v4 = vpop.f32.mrb[16].mxu1  ;;  %v1941_v36 = vpop.f32.mrb[17].mxu0 }
 0x128   : > { %v2005_v16 = vpop.f32.mrb[17].mxu1  ;;  %v1942_v18 = vadd.f32 %v1941_v36, %v1940_v7  ;;  %v1943_v56 = vpop.f32.mrb[18].mxu0 }
 0x129   : > { %v2006_v35 = vadd.f32 %v2005_v16, %v2004_v4  ;;  %v2007_v48 = vpop.f32.mrb[18].mxu1  ;;  %v1944_v19 = vpop.f32.mrb[19].mxu0 }
 0x12a   : > { %v2008_v53 = vpop.f32.mrb[19].mxu1  ;;  %v1131_v20 = vadd.f32 %v1942_v18, %v3047_v17  ;;  %v1945_v13 = vadd.f32 %v1944_v19, %v1943_v56 }
 0x12b   : > { %v2009_v15 = vadd.f32 %v2008_v53, %v2007_v48 }
 0x12c   : > { %v3074_v25 = vadd.f32 %v2006_v35, %v1131_v20  ;;  %v1134_v26 = vadd.f32 %v1945_v13, %v3047_v17 }
 0x12e   : > { %v3077_v32 = vadd.f32 %v2009_v15, %v1134_v26  ;;  %v1946_v33 = vpop.f32.mrb[20].mxu0 }
 0x12f   : > { %v2010_v22 = vpop.f32.mrb[20].mxu1  ;;  %v1947_v37 = vpop.f32.mrb[21].mxu0 }
 0x130   : > { %v2011_v24 = vpop.f32.mrb[21].mxu1  ;;  %v1948_v38 = vadd.f32 %v1947_v37, %v1946_v33  ;;  %v1949_v39 = vpop.f32.mrb[22].mxu0 }
 0x131   : > { %v2012_v27 = vadd.f32 %v2011_v24, %v2010_v22  ;;  %v2013_v29 = vpop.f32.mrb[22].mxu1  ;;  %v1950_v40 = vpop.f32.mrb[23].mxu0 }
 0x132   : > { %v2014_v30 = vpop.f32.mrb[23].mxu1  ;;  %v1139_v41 = vadd.f32 %v1948_v38, %v3047_v17  ;;  %v1951_v43 = vadd.f32 %v1950_v40, %v1949_v39 }
 0x133   : > { %v2015_v34 = vadd.f32 %v2014_v30, %v2013_v29 }
 0x134   : > { %v3080_v46 = vadd.f32 %v2012_v27, %v1139_v41  ;;  %v1142_v49 = vadd.f32 %v1951_v43, %v3047_v17 }
 0x136   : > { %v3083_v55 = vadd.f32 %v2015_v34, %v1142_v49  ;;  %v1952_v57 = vpop.f32.mrb[24].mxu0 }
 0x137   : > { %v2016_v44 = vpop.f32.mrb[24].mxu1  ;;  %v1953_v59 = vpop.f32.mrb[25].mxu0 }
 0x138   : > { %v2017_v45 = vpop.f32.mrb[25].mxu1  ;;  %v1954_v60 = vadd.f32 %v1953_v59, %v1952_v57  ;;  %v1955_v61 = vpop.f32.mrb[26].mxu0 }
 0x139   : > { %v2018_v50 = vadd.f32 %v2017_v45, %v2016_v44  ;;  %v2019_v51 = vpop.f32.mrb[26].mxu1  ;;  %v1956_v0 = vpop.f32.mrb[27].mxu0 }
 0x13a   : > { %v2020_v54 = vpop.f32.mrb[27].mxu1  ;;  %v1147_v1 = vadd.f32 %v1954_v60, %v3047_v17  ;;  %v1957_v3 = vadd.f32 %v1956_v0, %v1955_v61 }
 0x13b   : > { %v2021_v58 = vadd.f32 %v2020_v54, %v2019_v51 }
 0x13c   : > { %v3086_v10 = vadd.f32 %v2018_v50, %v1147_v1  ;;  %v1150_v11 = vadd.f32 %v1957_v3, %v3047_v17 }
 0x13e   : > { %v3089_v62 = vadd.f32 %v2021_v58, %v1150_v11  ;;  %v1958_v2 = vpop.f32.mrb[28].mxu0 }
 0x13f   : > { %v2022_v5 = vpop.f32.mrb[28].mxu1  ;;  %v1959_v16 = vpop.f32.mrb[29].mxu0 }
 0x140   : > { %v2023_v9 = vpop.f32.mrb[29].mxu1  ;;  %v1960_v31 = vadd.f32 %v1959_v16, %v1958_v2  ;;  %v1961_v35 = vpop.f32.mrb[30].mxu0 }
 0x141   : > { %v2024_v12 = vadd.f32 %v2023_v9, %v2022_v5  ;;  %v2025_v14 = vpop.f32.mrb[30].mxu1  ;;  %v1962_v48 = vpop.f32.mrb[31].mxu0 }
 0x142   : > { %v2026_v52 = vpop.f32.mrb[31].mxu1  ;;  %v1155_v53 = vadd.f32 %v1960_v31, %v3047_v17  ;;  %v1963_v7 = vadd.f32 %v1962_v48, %v1961_v35 }
 0x143   : > { %v2027_v4 = vadd.f32 %v2026_v52, %v2025_v14 }
 0x144   : > { %v3092_v18 = vadd.f32 %v2024_v12, %v1155_v53  ;;  %v1158_v56 = vadd.f32 %v1963_v7, %v3047_v17 }
 0x146   : > { %v3095_v22 = vadd.f32 %v2027_v4, %v1158_v56  ;;  %v2044_v24 = vpop.f32.mrb[32].mxu0 }
 0x147   : > { %v2108_v15 = vpop.f32.mrb[32].mxu1  ;;  %v2045_v27 = vpop.f32.mrb[33].mxu0 }
 0x148   : > { %v2109_v36 = vpop.f32.mrb[33].mxu1  ;;  %v2046_v29 = vadd.f32 %v2045_v27, %v2044_v24  ;;  %v2047_v30 = vpop.f32.mrb[34].mxu0 }
 0x149   : > { %v2110_v19 = vadd.f32 %v2109_v36, %v2108_v15  ;;  %v2111_v20 = vpop.f32.mrb[34].mxu1  ;;  %v2048_v33 = vpop.f32.mrb[35].mxu0 }
 0x14a   : > { %v2112_v13 = vpop.f32.mrb[35].mxu1  ;;  %v1293_v34 = vadd.f32 %v2046_v29, %v3050_v23  ;;  %v2049_v37 = vadd.f32 %v2048_v33, %v2047_v30 }
 0x14b   : > { %v2113_v26 = vadd.f32 %v2112_v13, %v2111_v20 }
 0x14c   : > { %v1296_v40 = vadd.f32 %v2049_v37, %v3053_v28  ;;  %v3099_v43 = vadd.f32 %v2110_v19, %v1293_v34 }
 0x14e   : > { %v2050_v45 = vpop.f32.mrb[36].mxu0  ;;  %v3101_v50 = vadd.f32 %v2113_v26, %v1296_v40 }
 0x14f   : > { %v2114_v38 = vpop.f32.mrb[36].mxu1  ;;  %v2051_v51 = vpop.f32.mrb[37].mxu0 }
 0x150   : > { %v2115_v39 = vpop.f32.mrb[37].mxu1  ;;  %v2052_v54 = vadd.f32 %v2051_v51, %v2050_v45  ;;  %v2053_v57 = vpop.f32.mrb[38].mxu0 }
 0x151   : > { %v2116_v41 = vadd.f32 %v2115_v39, %v2114_v38  ;;  %v2117_v17 = vpop.f32.mrb[38].mxu1  ;;  %v2054_v58 = vpop.f32.mrb[39].mxu0 }
 0x152   : > { %v2118_v44 = vpop.f32.mrb[39].mxu1  ;;  %v1301_v23 = vadd.f32 %v2052_v54, %v3056_v42  ;;  %v2055_v59 = vadd.f32 %v2054_v58, %v2053_v57 }
 0x153   : > { %v2119_v49 = vadd.f32 %v2118_v44, %v2117_v17 }
 0x154   : > { %v1304_v28 = vadd.f32 %v2055_v59, %v3059_v47  ;;  %v3105_v3 = vadd.f32 %v2116_v41, %v1301_v23 }
 0x156   : > { %v2056_v9 = vpop.f32.mrb[40].mxu0  ;;  %v3107_v12 = vadd.f32 %v2119_v49, %v1304_v28 }
 0x157   : > { %v2120_v60 = vpop.f32.mrb[40].mxu1  ;;  %v2057_v14 = vpop.f32.mrb[41].mxu0 }
 0x158   : > { %v2121_v61 = vpop.f32.mrb[41].mxu1  ;;  %v2058_v52 = vadd.f32 %v2057_v14, %v2056_v9  ;;  %v2059_v2 = vpop.f32.mrb[42].mxu0 }
 0x159   : > { %v2122_v0 = vadd.f32 %v2121_v61, %v2120_v60  ;;  %v2123_v1 = vpop.f32.mrb[42].mxu1  ;;  %v2060_v4 = vpop.f32.mrb[43].mxu0 }
 0x15a   : > { %v2124_v5 = vpop.f32.mrb[43].mxu1  ;;  %v1309_v42 = vadd.f32 %v2058_v52, %v3062_v63  ;;  %v2061_v16 = vadd.f32 %v2060_v4, %v2059_v2 }
 0x15b   : > { %v2125_v11 = vadd.f32 %v2124_v5, %v2123_v1 }
 0x15c   : > { %v1312_v47 = vadd.f32 %v2061_v16, %v3065_v8  ;;  %v3111_v7 = vadd.f32 %v2122_v0, %v1309_v42 }
 0x15e   : > { %v2062_v36 = vpop.f32.mrb[44].mxu0  ;;  %v3113_v19 = vadd.f32 %v2125_v11, %v1312_v47 }
 0x15f   : > { %v2126_v31 = vpop.f32.mrb[44].mxu1  ;;  %v2063_v20 = vpop.f32.mrb[45].mxu0 }
 0x160   : > { %v2127_v35 = vpop.f32.mrb[45].mxu1  ;;  %v2064_v13 = vadd.f32 %v2063_v20, %v2062_v36  ;;  %v2065_v24 = vpop.f32.mrb[46].mxu0 }
 0x161   : > { %v2128_v48 = vadd.f32 %v2127_v35, %v2126_v31  ;;  %v2129_v53 = vpop.f32.mrb[46].mxu1  ;;  %v2066_v26 = vpop.f32.mrb[47].mxu0 }
 0x162   : > { %v2130_v15 = vpop.f32.mrb[47].mxu1  ;;  %v1317_v63 = vadd.f32 %v2064_v13, %v3068_v21  ;;  %v2067_v27 = vadd.f32 %v2066_v26, %v2065_v24 }
 0x163   : > { %v2131_v56 = vadd.f32 %v2130_v15, %v2129_v53 }
 0x164   : > { %v1320_v8 = vadd.f32 %v2067_v27, %v3071_v6  ;;  %v3117_v37 = vadd.f32 %v2128_v48, %v1317_v63 }
 0x166   : > { %v2068_v39 = vpop.f32.mrb[48].mxu0  ;;  %v3119_v41 = vadd.f32 %v2131_v56, %v1320_v8 }
 0x167   : > { %v2132_v29 = vpop.f32.mrb[48].mxu1  ;;  %v2069_v17 = vpop.f32.mrb[49].mxu0 }
 0x168   : > { %v2133_v30 = vpop.f32.mrb[49].mxu1  ;;  %v2070_v44 = vadd.f32 %v2069_v17, %v2068_v39  ;;  %v2071_v45 = vpop.f32.mrb[50].mxu0 }
 0x169   : > { %v2134_v33 = vadd.f32 %v2133_v30, %v2132_v29  ;;  %v2135_v34 = vpop.f32.mrb[50].mxu1  ;;  %v2072_v49 = vpop.f32.mrb[51].mxu0 }
 0x16a   : > { %v2136_v38 = vpop.f32.mrb[51].mxu1  ;;  %v1325_v21 = vadd.f32 %v2070_v44, %v3074_v25  ;;  %v2073_v51 = vadd.f32 %v2072_v49, %v2071_v45 }
 0x16b   : > { %v2137_v40 = vadd.f32 %v2136_v38, %v2135_v34 }
 0x16c   : > { %v1328_v6 = vadd.f32 %v2073_v51, %v3077_v32  ;;  %v1422_v59 = vadd.f32 %v2134_v33, %v1325_v21 }
 0x16e   : > { %v2074_v61 = vpop.f32.mrb[52].mxu0  ;;  %v1425_v0 = vadd.f32 %v2137_v40, %v1328_v6 }
 0x16f   : > { %v2138_v54 = vpop.f32.mrb[52].mxu1  ;;  %v2075_v1 = vpop.f32.mrb[53].mxu0 }
 0x170   : > { %v2139_v57 = vpop.f32.mrb[53].mxu1  ;;  %v2076_v5 = vadd.f32 %v2075_v1, %v2074_v61  ;;  %v2077_v9 = vpop.f32.mrb[54].mxu0 }
 0x171   : > { %v2140_v58 = vadd.f32 %v2139_v57, %v2138_v54  ;;  %v2141_v23 = vpop.f32.mrb[54].mxu1  ;;  %v2078_v11 = vpop.f32.mrb[55].mxu0 }
 0x172   : > { %v2142_v60 = vpop.f32.mrb[55].mxu1  ;;  %v1333_v14 = vadd.f32 %v2076_v5, %v3080_v46  ;;  %v2079_v52 = vadd.f32 %v2078_v11, %v2077_v9 }
 0x173   : > { %v2143_v28 = vadd.f32 %v2142_v60, %v2141_v23 }
 0x174   : > { %v1336_v4 = vadd.f32 %v2079_v52, %v3083_v55  ;;  %v1430_v16 = vadd.f32 %v2140_v58, %v1333_v14 }
 0x176   : > { %v2080_v35 = vpop.f32.mrb[56].mxu0  ;;  %v1433_v48 = vadd.f32 %v2143_v28, %v1336_v4 }
 0x177   : > { %v2144_v25 = vpop.f32.mrb[56].mxu1  ;;  %v2081_v53 = vpop.f32.mrb[57].mxu0 }
 0x178   : > { %v2145_v2 = vpop.f32.mrb[57].mxu1  ;;  %v2082_v15 = vadd.f32 %v2081_v53, %v2080_v35  ;;  %v2083_v36 = vpop.f32.mrb[58].mxu0 }
 0x179   : > { %v2146_v42 = vadd.f32 %v2145_v2, %v2144_v25  ;;  %v2147_v32 = vpop.f32.mrb[58].mxu1  ;;  %v2084_v56 = vpop.f32.mrb[59].mxu0 }
 0x17a   : > { %v2148_v31 = vpop.f32.mrb[59].mxu1  ;;  %v1341_v20 = vadd.f32 %v2082_v15, %v3086_v10  ;;  %v2085_v13 = vadd.f32 %v2084_v56, %v2083_v36 }
 0x17b   : > { %v2149_v47 = vadd.f32 %v2148_v31, %v2147_v32 }
 0x17c   : > { %v1344_v26 = vadd.f32 %v2085_v13, %v3089_v62  ;;  %v1438_v27 = vadd.f32 %v2146_v42, %v1341_v20 }
 0x17e   : > { %v2086_v30 = vpop.f32.mrb[60].mxu0  ;;  %v1441_v33 = vadd.f32 %v2149_v47, %v1344_v26 }
 0x17f   : > { %v2150_v46 = vpop.f32.mrb[60].mxu1  ;;  %v2087_v34 = vpop.f32.mrb[61].mxu0 }
 0x180   : > { %v2151_v24 = vpop.f32.mrb[61].mxu1  ;;  %v2088_v38 = vadd.f32 %v2087_v34, %v2086_v30  ;;  %v2089_v39 = vpop.f32.mrb[62].mxu0 }
 0x181   : > { %v2152_v63 = vadd.f32 %v2151_v24, %v2150_v46  ;;  %v2153_v55 = vpop.f32.mrb[62].mxu1  ;;  %v2090_v40 = vpop.f32.mrb[63].mxu0 }
 0x182   : > { %v2154_v29 = vpop.f32.mrb[63].mxu1  ;;  %v1349_v17 = vadd.f32 %v2088_v38, %v3092_v18  ;;  %v2091_v44 = vadd.f32 %v2090_v40, %v2089_v39 }
 0x183   : > { %v2155_v8 = vadd.f32 %v2154_v29, %v2153_v55 }
 0x184   : > { %v1352_v62 = vadd.f32 %v2091_v44, %v3095_v22  ;;  %v1446_v54 = vadd.f32 %v2152_v63, %v1349_v17 }
 0x186   : > { %v2190_v23 = vpop.f32.mrb[64].mxu0  ;;  %v1449_v61 = vadd.f32 %v2155_v8, %v1352_v62 }
 0x187   : > { %v2198_v10 = vpop.f32.mrb[64].mxu1  ;;  %v3140_v28 = vadd.f32 %v2190_v23, %v3105_v3  ;;  %v1486_v22 = vpop.f32.mrb[65].mxu0 }
 0x188   : > { %v3128_v45 = vadd.f32 %v2198_v10, %v1430_v16  ;;  %v1518_v49 = vpop.f32.mrb[65].mxu1  ;;  %v3144_v1 = vadd.f32 %v1486_v22, %v3099_v43  ;;  %v2191_v5 = vpop.f32.mrb[66].mxu0 }
 0x189   : > { %v3131_v21 = vadd.f32 %v1518_v49, %v1422_v59  ;;  %v2199_v51 = vpop.f32.mrb[66].mxu1  ;;  %v1877_v11 = vmul.f32 -1.442695, %v3140_v28  ;;  %v1489_v14 = vpop.f32.mrb[67].mxu0 }
 0x18a   : > { %v1885_v57 = vmul.f32 -1.442695, %v3128_v45  ;;  %v3134_v6 = vadd.f32 %v2199_v51, %v1433_v48  ;;  %v1521_v58 = vpop.f32.mrb[67].mxu1  ;;  %v1875_v3 = vmul.f32 -1.442695, %v3144_v1  ;;  %v3153_v52 = vadd.f32 %v1489_v14, %v3101_v50 }
 0x18b   : > { %v1883_v60 = vmul.f32 -1.442695, %v3131_v21  ;;  %v3137_v18 = vadd.f32 %v1521_v58, %v1425_v0  ;;  %v3149_v0 = vadd.f32 %v2191_v5, %v3107_v12 }
 0x18c   : > { %2386 = vpow2.f32 %v1885_v57  ;;  %v1886_v59 = vmul.f32 -1.442695, %v3134_v6  ;;  %v1876_v42 = vmul.f32 -1.442695, %v3153_v52 }
 0x18d   : > { %2388 = vpow2.f32 %v1883_v60  ;;  %v1884_v9 = vmul.f32 -1.442695, %v3137_v18  ;;  %v1878_v43 = vmul.f32 -1.442695, %v3149_v0 }
 0x18e   : > { %2390 = vpow2.f32 %v1886_v59  ;;  %v2194_v35 = vpop.f32.mrb[68].mxu0 }
 0x18f   : > { %2392 = vpow2.f32 %v1884_v9  ;;  %v2202_v25 = vpop.f32.mrb[68].mxu1  ;;  %v3168_v53 = vadd.f32 %v2194_v35, %v3117_v37  ;;  %v1502_v15 = vpop.f32.mrb[69].mxu0 }
 0x190   : > { %2394 = vpow2.f32 %v1877_v11  ;;  %v3156_v2 = vadd.f32 %v2202_v25, %v1446_v54  ;;  %v1534_v4 = vpop.f32.mrb[69].mxu1  ;;  %v3172_v56 = vadd.f32 %v1502_v15, %v3111_v7  ;;  %v2195_v20 = vpop.f32.mrb[70].mxu0 }
 0x191   : > { %2396 = vpow2.f32 %v1875_v3  ;;  %v3159_v12 = vadd.f32 %v1534_v4, %v1438_v27  ;;  %v2203_v32 = vpop.f32.mrb[70].mxu1  ;;  %v1881_v24 = vmul.f32 -1.442695, %v3168_v53  ;;  %v3177_v26 = vadd.f32 %v2195_v20, %v3119_v41  ;;  %v1505_v37 = vpop.f32.mrb[71].mxu0 }
 0x192   : > { %2398 = vpow2.f32 %v1878_v43  ;;  %v1889_v16 = vmul.f32 -1.442695, %v3156_v2  ;;  %v3162_v31 = vadd.f32 %v2203_v32, %v1449_v61  ;;  %v1537_v50 = vpop.f32.mrb[71].mxu1  ;;  %v3180_v27 = vadd.f32 %v1505_v37, %v3113_v19 }
 0x193   : > { %2400 = vpow2.f32 %v1876_v42  ;;  %v1887_v47 = vmul.f32 -1.442695, %v3159_v12  ;;  %v3165_v48 = vadd.f32 %v1537_v50, %v1441_v33  ;;  %v1879_v49 = vmul.f32 -1.442695, %v3172_v56 }
 0x194   : > { %2402 = vpow2.f32 %v1889_v16  ;;  %v1890_v36 = vmul.f32 -1.442695, %v3162_v31  ;;  %v1882_v58 = vmul.f32 -1.442695, %v3177_v26  ;;  %v1880_v5 = vmul.f32 -1.442695, %v3180_v27 }
 0x195   : > { %2404 = vpow2.f32 %v1887_v47  ;;  %v1888_v13 = vmul.f32 -1.442695, %v3165_v48 }
 0x196   : > { %v2387_v46 = vpop.eup %2386  ;;  %2406 = vpow2.f32 %v1890_v36 }
 0x197   : > { %v2389_v63 = vpop.eup %2388  ;;  %v1607_v55 = vadd.f32 1.0, %v2387_v46  ;;  %2408 = vpow2.f32 %v1888_v13 }
 0x198   : > { %v2391_v7 = vpop.eup %2390  ;;  %v1605_v29 = vadd.f32 1.0, %v2389_v63  ;;  %2410 = vpow2.f32 %v1881_v24 }
 0x199   : > { %v2393_v30 = vpop.eup %2392  ;;  %2412 = vrcp.f32 %v1607_v55  ;;  %v1608_v8 = vadd.f32 1.0, %v2391_v7 }
 0x19a   : > { %v2395_v33 = vpop.eup %2394  ;;  %2414 = vrcp.f32 %v1605_v29  ;;  %v1606_v34 = vadd.f32 1.0, %v2393_v30 }
 0x19b   : > { %v2397_v41 = vpop.eup %2396  ;;  %v1599_v38 = vadd.f32 1.0, %v2395_v33  ;;  %2416 = vrcp.f32 %v1608_v8 }
 0x19c   : > { %v2399_v39 = vpop.eup %2398  ;;  %v1597_v40 = vadd.f32 1.0, %v2397_v41  ;;  %2418 = vrcp.f32 %v1606_v34 }
 0x19d   : > { %v2401_v19 = vpop.eup %2400  ;;  %2420 = vrcp.f32 %v1599_v38  ;;  %v1600_v17 = vadd.f32 1.0, %v2399_v39 }
 0x19e   : > { %v2403_v44 = vpop.eup %2402  ;;  %2422 = vrcp.f32 %v1597_v40  ;;  %v1598_v10 = vadd.f32 1.0, %v2401_v19 }
 0x19f   : > { %v2405_v62 = vpop.eup %2404  ;;  %2424 = vrcp.f32 %v1600_v17  ;;  %v1611_v51 = vadd.f32 1.0, %v2403_v44 }
 0x1a0   : > { %v2407_v54 = vpop.eup %2406  ;;  %2426 = vrcp.f32 %v1598_v10  ;;  %v1609_v57 = vadd.f32 1.0, %v2405_v62 }
 0x1a1   : > { %v2409_v23 = vpop.eup %2408  ;;  %2428 = vrcp.f32 %v1611_v51  ;;  %v1612_v61 = vadd.f32 1.0, %v2407_v54 }
 0x1a2   : > { %v2411_v60 = vpop.eup %2410  ;;  %2430 = vpow2.f32 %v1879_v49  ;;  %v1610_v14 = vadd.f32 1.0, %v2409_v23 }
 0x1a3   : > { %v2413_v22 = vpop.eup %2412  ;;  %v1603_v59 = vadd.f32 1.0, %v2411_v60  ;;  %2432 = vrcp.f32 %v1609_v57 }
 0x1a4   : > { %v2415_v9 = vpop.eup %2414  ;;  %v1655_v11 = vmul.f32 %v2413_v22, %v3128_v45  ;;  %2434 = vpow2.f32 %v1882_v58 }
 0x1a5   : > { %v2417_v3 = vpop.eup %2416  ;;  %v1653_v25 = vmul.f32 %v2415_v9, %v3131_v21  ;;  %2436 = vrcp.f32 %v1603_v59 }
 0x1a6   : > { %v2419_v43 = vpop.eup %2418  ;;  %1671 = vst [vmem:[%s3190_s9 + $0x50] sm:$0xff] %v1655_v11  ;;  %v1656_v4 = vmul.f32 %v2417_v3, %v3134_v6  ;;  %2438 = vrcp.f32 %v1612_v61 }
 0x1a7   : > { %v2421_v45 = vpop.eup %2420  ;;  %1669 = vst [vmem:[%s3190_s9 + $0x40] sm:$0xff] %v1653_v25  ;;  %v1654_v42 = vmul.f32 %v2419_v43, %v3137_v18  ;;  %2440 = vpow2.f32 %v1880_v5 }
 0x1a8   : > { %v2423_v21 = vpop.eup %2422  ;;  %v1647_v32 = vmul.f32 %v2421_v45, %v3140_v28  ;;  %1672 = vst [vmem:[%s3190_s9 + $0x58] sm:$0xff] %v1656_v4  ;;  %2442 = vrcp.f32 %v1610_v14 }
 0x1a9   : > { %v2425_v16 = vpop.eup %2424  ;;  %v1645_v50 = vmul.f32 %v2423_v21, %v3144_v1  ;;  %1670 = vst [vmem:[%s3190_s9 + $0x48] sm:$0xff] %v1654_v42 }
 0x1aa   : > { %v2427_v6 = vpop.eup %2426  ;;  %1663 = vst [vmem:[%s3190_s9 + $0x10] sm:$0xff] %v1647_v32  ;;  %v1648_v35 = vmul.f32 %v2425_v16, %v3149_v0 }
 0x1ab   : > { %v2429_v47 = vpop.eup %2428  ;;  %1661 = vst [vmem:[%s3190_s9] sm:$0xff] %v1645_v50  ;;  %v1646_v18 = vmul.f32 %v2427_v6, %v3153_v52 }
 0x1ac   : > { %v2431_v15 = vpop.eup %2430  ;;  %1664 = vst [vmem:[%s3190_s9 + $0x18] sm:$0xff] %v1648_v35  ;;  %v1659_v28 = vmul.f32 %v2429_v47, %v3156_v2 }
 0x1ad   : > { %v2433_v36 = vpop.eup %2432  ;;  %1662 = vst [vmem:[%s3190_s9 + $0x8] sm:$0xff] %v1646_v18  ;;  %v1601_v20 = vadd.f32 1.0, %v2431_v15 }
 0x1ae   : > { %v2435_v1 = vpop.eup %2434  ;;  %1675 = vst [vmem:[%s3190_s9 + $0x70] sm:$0xff] %v1659_v28  ;;  %v1657_v13 = vmul.f32 %v2433_v36, %v3159_v12 }
 0x1af   : > { %v2437_v0 = vpop.eup %2436  ;;  %2444 = vrcp.f32 %v1601_v20  ;;  %v1604_v46 = vadd.f32 1.0, %v2435_v1 }
 0x1b0   : > { %v2439_v52 = vpop.eup %2438  ;;  %v1651_v24 = vmul.f32 %v2437_v0, %v3168_v53  ;;  %1673 = vst [vmem:[%s3190_s9 + $0x60] sm:$0xff] %v1657_v13 }
 0x1b1   : > { %v2441_v2 = vpop.eup %2440  ;;  %2446 = vrcp.f32 %v1604_v46  ;;  %v1660_v37 = vmul.f32 %v2439_v52, %v3162_v31 }
 0x1b2   : > { %v2443_v63 = vpop.eup %2442  ;;  %1667 = vst [vmem:[%s3190_s9 + $0x30] sm:$0xff] %v1651_v24  ;;  %v1602_v55 = vadd.f32 1.0, %v2441_v2 }
 0x1b3   : > { %1676 = vst [vmem:[%s3190_s9 + $0x78] sm:$0xff] %v1660_v37  ;;  %v1658_v12 = vmul.f32 %v2443_v63, %v3165_v48 }
 0x1b4   : > { %2448 = vrcp.f32 %v1602_v55 }
 0x1b5   : > { %1674 = vst [vmem:[%s3190_s9 + $0x68] sm:$0xff] %v1658_v12 }
 0x1b9   : > { %v2445_v53 = vpop.eup %2444 }
 0x1ba   : > { %v1649_v7 = vmul.f32 %v2445_v53, %v3172_v56 }
 0x1bb   : > { %v2447_v31 = vpop.eup %2446 }
 0x1bc   : > { %1665 = vst [vmem:[%s3190_s9 + $0x20] sm:$0xff] %v1649_v7  ;;  %v1652_v29 = vmul.f32 %v2447_v31, %v3177_v26 }
 0x1be   : > { %v2449_v30 = vpop.eup %2448  ;;  %1668 = vst [vmem:[%s3190_s9 + $0x38] sm:$0xff] %v1652_v29 }
 0x1bf   : > { %v1650_v48 = vmul.f32 %v2449_v30, %v3180_v27 }
 0x1c1   : > { %1666 = vst [vmem:[%s3190_s9 + $0x28] sm:$0xff] %v1650_v48 }
 0x1c2   : > { %2463 = shalt.err (!%p2460_p6)
}
 0x1c3   : > { %s2464_s28 = scalar_lea.hbm %s3226_s6, 2048  ;;  %s2468_s10 = scalar_lea.hbm %s3289_s3, 8192 }
 0x1c4   : > { %p2465_p7 = scmp.ne.s32.totalorder %s3226_s6, %s2464_s28  ;;  %p2469_p11 = scmp.lt.u32.totalorder %s3226_s6, %s3289_s3 }
 0x1c5   : > { %p2470_p12 = scmp.lt.u32.totalorder %s2468_s10, %s2464_s28  ;;  %p2472_p0 = scmp.lt.u32.totalorder %s2464_s28, %s3226_s6 }
 0x1c6   : > { %p2466_p9 = pnand %p2465_p7, %p2620_p3 }
 0x1c7   : > { %p2471_p13 = por %p2470_p12, %p2469_p11 }
 0x1c8   : > { %p2467_p10 = pneg %p2466_p9 }
 0x1c9   : > { %p2473_p1 = por %p2472_p0, %p2471_p13 }
 0x1cb   : > { %p2474_p2 = pnand %p2473_p1, %p2467_p10 }
 0x1cd   : > { %2477 = shalt.err (!%p2474_p2)
}
 0x1ce   : > { %s2547_s24 = smov 128   ;;  %s2548_s29 = smov 8  }
 0x1cf   : > { %2221 = dma.vmem_to_hbm [thread:$0]  (%p2620_p3), %s3228_s27, 2048, %s3226_s6, %s3234_s15, %s2547_s24, %s2547_s24, %s2548_s29  }
 0x1d0 PF: > { %p2227_p4 = scmp.ge.s32.totalorder %s2544_s19, 2  ;;  %s1709_s11 = sand.u32 1, %s2516_s12  }
 0x1d1   : > { %s1710_s16 = scalar_lea.sflag [#allocation3], %s1709_s11 }
 0x1d2   : > { %p2224_p5 = pnand %p2227_p4, %p2629_p8 }
 0x1d4   : > { %2511 = dma.done.wait (!%p2224_p5), %s1710_s16, 2048  }
 0x1d5   : > { %2513 = vsyncadd (!%p2224_p5), %s1710_s16, 4294965248  ;;  %s16_s19 = sadd.s32 1, %s2544_s19   ;;  %s3292_s12 = smov %s2520_s13 }
 0x1d6   : > { %p13_p6 = scmp.ge.s32.totalorder %s16_s19, 6   ;;  %s3293_s13 = smov %s2524_s14 }
 0x1d7   : > { %s3294_s14 = smov %s2638_s30  ;;  %s3295_s15 = smov %s2536_s17 }
 0x1d8   : > { %s3296_s16 = smov %s2540_s18  ;;  %s3297_s17 = smov %s3300_s22 }
 0x1d9   : > { %s3298_s18 = smov %s3304_s23  ;;  %15 = sbr.rel (!%p13_p6) target bundleno = 5 (0x5), region = 68 }
 0x1e0   :  { %1715 = vsyncpa [#allocation3], 1 }
 0x1e1   :  { %1717 = vsyncpa [#allocation3 + $0x1], 1 }

</bundles_post_ra>
